<compile_context>
chip_gen: v7x
topology: tpu7x:2x2x1
jax: 0.10.0
libtpu: 0.0.40
codegen_flags: <defaults>
</compile_context>

<pallas_src>
import functools

import jax
import jax.numpy as jnp
import numpy as np
from jax.experimental import pallas as pl
from jax.experimental.pallas import tpu as pltpu

EPS = 1e-5  # PyTorch BatchNorm2d default


def _round_up(a, b):
    return (a + b - 1) // b * b


def _taps(parity):
    # ConvTranspose2d(k=4, s=2, p=1): output index o = 2*i + k - 1.
    # For output parity r, only taps k with k ≡ (r+1) (mod 2) contribute; each
    # tap pairs with input offset d = i - floor(o/2).
    return ((1, 0), (3, -1)) if parity == 0 else ((0, 1), (2, 0))


# --------------------------------------------------------------------------- #
# Pass 1: per-phase GEMM (bf16 in, f32 acc) + per-tile BN partial statistics.
# --------------------------------------------------------------------------- #
def _conv_stats_kernel(a_ref, w_ref, y_ref, stats_ref):
    # a_ref     : (1, TILE_M, KC_PAD)   bf16 sub-pixel im2col rows
    # w_ref     : (1, KC_PAD, COUT_PAD) bf16 per-phase weight
    # y_ref     : (1, TILE_M, COUT_PAD) f32 conv output (pre-BN)
    # stats_ref : (1, 1, 8, COUT_PAD)   f32 rows 0/1 = sum / sum-of-squares
    a = a_ref[0]
    w = w_ref[0]
    y = jnp.dot(a, w, preferred_element_type=jnp.float32)
    y_ref[...] = y[None]

    s1 = jnp.sum(y, axis=0, keepdims=True)          # (1, COUT_PAD)
    s2 = jnp.sum(y * y, axis=0, keepdims=True)      # (1, COUT_PAD)
    pad = jnp.zeros((6, y.shape[1]), jnp.float32)
    stats_ref[...] = jnp.concatenate([s1, s2, pad], axis=0)[None, None]


# --------------------------------------------------------------------------- #
# Pass 2: y * scale + shift, ReLU (scale/shift pre-folded from BN params).
# --------------------------------------------------------------------------- #
def _bn_relu_kernel(y_ref, scale_ref, shift_ref, o_ref):
    y = y_ref[0]                                     # (TILE_M, COUT_PAD)
    o_ref[...] = jnp.maximum(y * scale_ref[...] + shift_ref[...], 0.0)[None]


@functools.partial(jax.jit, static_argnames=("tile_m",))
def upsampler_forward(x, w_t, conv_bias, gamma, beta, *, tile_m=256):
    """x: (N, C_in, H, W) NCHW.  w_t: (C_in, C_out, 4, 4) PyTorch ConvTranspose2d layout.

    Implements ConvTranspose2d(k=4, s=2, p=1) -> BatchNorm2d(training) -> ReLU.
    conv_bias is accepted for API parity but cancels exactly under training-mode BN.
    """
    del conv_bias  # per-channel shift cancels in (y - mean(y)) of BatchNorm
    N, C_in, H, W = x.shape
    C_in_w, C_out, KH, KW = w_t.shape
    assert C_in == C_in_w and KH == 4 and KW == 4

    f32 = jnp.float32
    xp = jnp.pad(x.astype(f32), ((0, 0), (0, 0), (1, 1), (1, 1)))

    M = N * H * W                        # rows per output phase
    KC = C_in * 4                        # 2x2 taps per phase
    KC_PAD = _round_up(KC, 8)
    COUT_PAD = _round_up(C_out, 128)     # lane-dense output / MXU columns
    TILE_M = min(tile_m, _round_up(M, 8))
    M_PAD = _round_up(M, TILE_M)
    nmt = M_PAD // TILE_M

    # ---- sub-pixel (pixel-shuffle) decomposition glue ---------------------- #
    a_phases, w_phases = [], []
    for rh in range(2):
        for rw in range(2):
            cols, taps = [], []
            for kh, dh in _taps(rh):
                for kw, dw in _taps(rw):
                    cols.append(xp[:, :, 1 + dh:1 + dh + H, 1 + dw:1 + dw + W])
                    taps.append(w_t[:, :, kh, kw].astype(f32))   # (C_in, C_out)
            a_p = jnp.stack(cols, axis=-1)                       # (N,Cin,H,W,4)
            a_p = a_p.transpose(0, 2, 3, 1, 4).reshape(M, KC)    # idx ci*4+t
            a_p = jnp.pad(a_p, ((0, M_PAD - M), (0, KC_PAD - KC)))
            w_p = jnp.stack(taps, axis=1).reshape(KC, C_out)     # idx ci*4+t
            w_p = jnp.pad(w_p, ((0, KC_PAD - KC), (0, COUT_PAD - C_out)))
            a_phases.append(a_p)
            w_phases.append(w_p)

    A = jnp.stack(a_phases).astype(jnp.bfloat16)     # (4, M_PAD, KC_PAD)
    Wm = jnp.stack(w_phases).astype(jnp.bfloat16)    # (4, KC_PAD, COUT_PAD)

    cparams = pltpu.CompilerParams(
        dimension_semantics=("parallel", "parallel"),   # megacore on v7x
        vmem_limit_bytes=32 * 1024 * 1024,              # safe on v5e/v6e/v7x
    )

    # ---- pass 1: conv GEMM + BN partial stats ------------------------------ #
    y_all, stats = pl.pallas_call(
        _conv_stats_kernel,
        grid=(4, nmt),
        in_specs=[
            pl.BlockSpec((1, TILE_M, KC_PAD), lambda p, m: (p, m, 0)),
            pl.BlockSpec((1, KC_PAD, COUT_PAD), lambda p, m: (p, 0, 0)),
        ],
        out_specs=(
            pl.BlockSpec((1, TILE_M, COUT_PAD), lambda p, m: (p, m, 0)),
            pl.BlockSpec((1, 1, 8, COUT_PAD), lambda p, m: (p, m, 0, 0)),
        ),
        out_shape=(
            jax.ShapeDtypeStruct((4, M_PAD, COUT_PAD), jnp.float32),
            jax.ShapeDtypeStruct((4, nmt, 8, COUT_PAD), jnp.float32),
        ),
        compiler_params=cparams,
    )(A, Wm)

    # ---- fold global BN stats into one per-channel scale/shift ------------- #
    count = jnp.float32(N * (2 * H) * (2 * W))       # true element count/channel
    ssum = jnp.sum(stats[:, :, 0, :], axis=(0, 1))   # padded rows contribute 0
    ssq = jnp.sum(stats[:, :, 1, :], axis=(0, 1))
    mean = ssum / count
    var = jnp.maximum(ssq / count - mean * mean, 0.0)    # biased, single-pass
    inv = jax.lax.rsqrt(var + EPS)
    gamma_pad = jnp.zeros((COUT_PAD,), f32).at[:C_out].set(gamma.astype(f32))
    beta_pad = jnp.zeros((COUT_PAD,), f32).at[:C_out].set(beta.astype(f32))
    scale = (gamma_pad * inv).reshape(1, COUT_PAD)
    shift = (beta_pad - mean * gamma_pad * inv).reshape(1, COUT_PAD)

    # ---- pass 2: normalize + ReLU in place (aliased onto y_all) ------------ #
    out_all = pl.pallas_call(
        _bn_relu_kernel,
        grid=(4, nmt),
        in_specs=[
            pl.BlockSpec((1, TILE_M, COUT_PAD), lambda p, m: (p, m, 0)),
            pl.BlockSpec((1, COUT_PAD), lambda p, m: (0, 0)),
            pl.BlockSpec((1, COUT_PAD), lambda p, m: (0, 0)),
        ],
        out_specs=pl.BlockSpec((1, TILE_M, COUT_PAD), lambda p, m: (p, m, 0)),
        out_shape=jax.ShapeDtypeStruct((4, M_PAD, COUT_PAD), jnp.float32),
        input_output_aliases={0: 0},
        compiler_params=cparams,
    )(y_all, scale, shift)

    # ---- un-pad and pixel-shuffle the 4 phases back to NCHW ---------------- #
    out = out_all[:, :M, :C_out].reshape(2, 2, N, H, W, C_out)
    out = out.transpose(2, 5, 3, 0, 4, 1).reshape(N, C_out, 2 * H, 2 * W)
    return out


def _reference_forward(x, w_t, conv_bias, gamma, beta, *, stride=2, padding=1):
    """Pure-JAX f32 reference (lax.conv_general_dilated) for correctness check."""
    K = w_t.shape[-1]
    rhs = jnp.transpose(w_t, (1, 0, 2, 3))[:, :, ::-1, ::-1]   # (C_out,C_in,K,K)
    pw = K - 1 - padding
    y = jax.lax.conv_general_dilated(
        x.astype(jnp.float32), rhs.astype(jnp.float32),
        window_strides=(1, 1),
        padding=((pw, pw), (pw, pw)),
        lhs_dilation=(stride, stride),
        dimension_numbers=("NCHW", "OIHW", "NCHW"),
    ) + conv_bias[None, :, None, None]
    mean = y.mean(axis=(0, 2, 3), keepdims=True)
    var = ((y - mean) ** 2).mean(axis=(0, 2, 3), keepdims=True)
    y = (y - mean) * jax.lax.rsqrt(var + EPS) * gamma[None, :, None, None] \
        + beta[None, :, None, None]
    return jnp.maximum(y, 0.0)


if __name__ == "__main__":
    # small shapes: batch=2, n_in=4, n_out=8, spatial=16 -> upsampled to 32
    N, C_IN, C_OUT, H, W, K = 2, 4, 8, 16, 16, 4

    key = jax.random.PRNGKey(0)
    kx, kw, kb, kg, kbeta = jax.random.split(key, 5)

    x = jax.random.normal(kx, (N, C_IN, H, W), dtype=jnp.float32)
    # PyTorch ConvTranspose2d weight layout: (in_channels, out_channels, kH, kW)
    w_t = 0.1 * jax.random.normal(kw, (C_IN, C_OUT, K, K), dtype=jnp.float32)
    conv_bias = 0.1 * jax.random.normal(kb, (C_OUT,), dtype=jnp.float32)
    gamma = 1.0 + 0.1 * jax.random.normal(kg, (C_OUT,), dtype=jnp.float32)
    beta = 0.1 * jax.random.normal(kbeta, (C_OUT,), dtype=jnp.float32)

    out = jax.block_until_ready(upsampler_forward(x, w_t, conv_bias, gamma, beta))
    assert out.shape == (N, C_OUT, 2 * H, 2 * W), out.shape

    ref = jax.block_until_ready(_reference_forward(x, w_t, conv_bias, gamma, beta))
    # bf16 MXU inputs -> tolerance loosened vs the pure-f32 path.
    np.testing.assert_allclose(np.asarray(out), np.asarray(ref), rtol=3e-2, atol=3e-2)

    print("KERNEL_OK")
</pallas_src>

<mosaic_0001>
module attributes {stable_mosaic.version = 11 : i64} {
  func.func @_conv_stats_kernel(%arg0: i32, %arg1: i32, %arg2: memref<1x256x16xbf16, #tpu.memory_space<vmem>>, %arg3: memref<1x16x128xbf16, #tpu.memory_space<vmem>>, %arg4: memref<1x256x128xf32, #tpu.memory_space<vmem>>, %arg5: memref<1x1x8x128xf32, #tpu.memory_space<vmem>>) attributes {dimension_semantics = [#tpu.dimension_semantics<parallel>, #tpu.dimension_semantics<parallel>], iteration_bounds = array<i64: 4, 2>, scalar_prefetch = 0 : i64, scratch_operands = 0 : i64, tpu.core_type = #tpu.core_type<tc>, window_params = [{transform_indices = @transform_0, window_bounds = array<i64: 1, 256, 16>}, {transform_indices = @transform_1, window_bounds = array<i64: 1, 16, 128>}, {transform_indices = @transform_2, window_bounds = array<i64: 1, 256, 128>}, {transform_indices = @transform_3, window_bounds = array<i64: 1, 1, 8, 128>}]} {
    %c0 = arith.constant 0 : index
    %c0_0 = arith.constant 0 : index
    %c0_1 = arith.constant 0 : index
    %0 = vector.load %arg2[%c0, %c0_0, %c0_1] : memref<1x256x16xbf16, #tpu.memory_space<vmem>>, vector<1x256x16xbf16>
    %1 = vector.shape_cast %0 : vector<1x256x16xbf16> to vector<256x16xbf16>
    %c0_2 = arith.constant 0 : index
    %c0_3 = arith.constant 0 : index
    %c0_4 = arith.constant 0 : index
    %2 = vector.load %arg3[%c0_2, %c0_3, %c0_4] : memref<1x16x128xbf16, #tpu.memory_space<vmem>>, vector<1x16x128xbf16>
    %3 = vector.shape_cast %2 : vector<1x16x128xbf16> to vector<16x128xbf16>
    %cst = arith.constant dense<0.000000e+00> : vector<256x128xf32>
    %4 = tpu.matmul %1, %3, %cst {dimension_numbers = #tpu.dot_dimension_numbers<[1], [0], [0], [1], [0, 0, 1, 1], [], []>} : vector<256x16xbf16>, vector<16x128xbf16>, vector<256x128xf32> -> vector<256x128xf32>
    %5 = vector.shape_cast %4 : vector<256x128xf32> to vector<1x256x128xf32>
    %c0_5 = arith.constant 0 : index
    %c0_6 = arith.constant 0 : index
    %c0_7 = arith.constant 0 : index
    %6 = vector.load %arg4[%c0_5, %c0_6, %c0_7] : memref<1x256x128xf32, #tpu.memory_space<vmem>>, vector<1x256x128xf32>
    tpu.vector_store %arg4[%c0_5, %c0_6, %c0_7], %5 {strides = array<i32>} : memref<1x256x128xf32, #tpu.memory_space<vmem>>, vector<1x256x128xf32>,
    %cst_8 = arith.constant dense<0.000000e+00> : vector<128xf32>
    %7 = vector.multi_reduction <add>, %4, %cst_8 [0] : vector<256x128xf32> to vector<128xf32>
    %8 = vector.shape_cast %7 : vector<128xf32> to vector<1x128xf32>
    %9 = arith.mulf %4, %4 : vector<256x128xf32>
    %cst_9 = arith.constant dense<0.000000e+00> : vector<128xf32>
    %10 = vector.multi_reduction <add>, %9, %cst_9 [0] : vector<256x128xf32> to vector<128xf32>
    %11 = vector.shape_cast %10 : vector<128xf32> to vector<1x128xf32>
    %cst_10 = arith.constant 0.000000e+00 : f32
    %12 = vector.broadcast %cst_10 : f32 to vector<6x128xf32>
    %13 = tpu.concatenate %8, %11, %12 in 0 : vector<1x128xf32>, vector<1x128xf32>, vector<6x128xf32> -> vector<8x128xf32>
    %14 = vector.shape_cast %13 : vector<8x128xf32> to vector<1x1x8x128xf32>
    %c0_11 = arith.constant 0 : index
    %c0_12 = arith.constant 0 : index
    %c0_13 = arith.constant 0 : index
    %c0_14 = arith.constant 0 : index
    %15 = vector.load %arg5[%c0_11, %c0_12, %c0_13, %c0_14] : memref<1x1x8x128xf32, #tpu.memory_space<vmem>>, vector<1x1x8x128xf32>
    tpu.vector_store %arg5[%c0_11, %c0_12, %c0_13, %c0_14], %14 {strides = array<i32>} : memref<1x1x8x128xf32, #tpu.memory_space<vmem>>, vector<1x1x8x128xf32>,
    return
  }
  func.func @transform_0(%arg0: i32, %arg1: i32) -> (i32, i32, i32) {
    %c0_i32 = arith.constant 0 : i32
    %c0_i32_0 = arith.constant 0 : i32
    return %arg0, %arg1, %c0_i32 : i32, i32, i32
  }
  func.func @transform_1(%arg0: i32, %arg1: i32) -> (i32, i32, i32) {
    %c0_i32 = arith.constant 0 : i32
    %c0_i32_0 = arith.constant 0 : i32
    %c0_i32_1 = arith.constant 0 : i32
    return %arg0, %c0_i32, %c0_i32_0 : i32, i32, i32
  }
  func.func @transform_2(%arg0: i32, %arg1: i32) -> (i32, i32, i32) {
    %c0_i32 = arith.constant 0 : i32
    %c0_i32_0 = arith.constant 0 : i32
    return %arg0, %arg1, %c0_i32 : i32, i32, i32
  }
  func.func @transform_3(%arg0: i32, %arg1: i32) -> (i32, i32, i32, i32) {
    %c0_i32 = arith.constant 0 : i32
    %c0_i32_0 = arith.constant 0 : i32
    %c0_i32_1 = arith.constant 0 : i32
    return %arg0, %arg1, %c0_i32, %c0_i32_0 : i32, i32, i32, i32
  }
}

module attributes {stable_mosaic.version = 11 : i64} {
  func.func @_bn_relu_kernel(%arg0: i32, %arg1: i32, %arg2: memref<1x256x128xf32, #tpu.memory_space<vmem>>, %arg3: memref<1x128xf32, #tpu.memory_space<vmem>>, %arg4: memref<1x128xf32, #tpu.memory_space<vmem>>, %arg5: memref<1x256x128xf32, #tpu.memory_space<vmem>>) attributes {dimension_semantics = [#tpu.dimension_semantics<parallel>, #tpu.dimension_semantics<parallel>], iteration_bounds = array<i64: 4, 2>, scalar_prefetch = 0 : i64, scratch_operands = 0 : i64, tpu.core_type = #tpu.core_type<tc>, window_params = [{transform_indices = @transform_0, window_bounds = array<i64: 1, 256, 128>}, {pipeline_mode = #tpu.pipeline_mode<synchronous>, transform_indices = @transform_1, window_bounds = array<i64: 1, 128>}, {pipeline_mode = #tpu.pipeline_mode<synchronous>, transform_indices = @transform_2, window_bounds = array<i64: 1, 128>}, {transform_indices = @transform_3, window_bounds = array<i64: 1, 256, 128>}]} {
    %c0 = arith.constant 0 : index
    %c0_0 = arith.constant 0 : index
    %c0_1 = arith.constant 0 : index
    %0 = vector.load %arg2[%c0, %c0_0, %c0_1] : memref<1x256x128xf32, #tpu.memory_space<vmem>>, vector<1x256x128xf32>
    %1 = vector.shape_cast %0 : vector<1x256x128xf32> to vector<256x128xf32>
    %c0_2 = arith.constant 0 : index
    %c0_3 = arith.constant 0 : index
    %2 = vector.load %arg3[%c0_2, %c0_3] : memref<1x128xf32, #tpu.memory_space<vmem>>, vector<1x128xf32>
    %3 = vector.broadcast %2 : vector<1x128xf32> to vector<256x128xf32>
    %4 = arith.mulf %1, %3 : vector<256x128xf32>
    %c0_4 = arith.constant 0 : index
    %c0_5 = arith.constant 0 : index
    %5 = vector.load %arg4[%c0_4, %c0_5] : memref<1x128xf32, #tpu.memory_space<vmem>>, vector<1x128xf32>
    %6 = vector.broadcast %5 : vector<1x128xf32> to vector<256x128xf32>
    %7 = arith.addf %4, %6 : vector<256x128xf32>
    %cst = arith.constant 0.000000e+00 : f32
    %8 = vector.broadcast %cst : f32 to vector<256x128xf32>
    %9 = arith.maximumf %7, %8 : vector<256x128xf32>
    %10 = vector.shape_cast %9 : vector<256x128xf32> to vector<1x256x128xf32>
    %c0_6 = arith.constant 0 : index
    %c0_7 = arith.constant 0 : index
    %c0_8 = arith.constant 0 : index
    %11 = vector.load %arg5[%c0_6, %c0_7, %c0_8] : memref<1x256x128xf32, #tpu.memory_space<vmem>>, vector<1x256x128xf32>
    tpu.vector_store %arg5[%c0_6, %c0_7, %c0_8], %10 {strides = array<i32>} : memref<1x256x128xf32, #tpu.memory_space<vmem>>, vector<1x256x128xf32>,
    return
  }
  func.func @transform_0(%arg0: i32, %arg1: i32) -> (i32, i32, i32) {
    %c0_i32 = arith.constant 0 : i32
    %c0_i32_0 = arith.constant 0 : i32
    return %arg0, %arg1, %c0_i32 : i32, i32, i32
  }
  func.func @transform_1(%arg0: i32, %arg1: i32) -> (i32, i32) {
    %c0_i32 = arith.constant 0 : i32
    %c0_i32_0 = arith.constant 0 : i32
    %c0_i32_1 = arith.constant 0 : i32
    return %c0_i32, %c0_i32_0 : i32, i32
  }
  func.func @transform_2(%arg0: i32, %arg1: i32) -> (i32, i32) {
    %c0_i32 = arith.constant 0 : i32
    %c0_i32_0 = arith.constant 0 : i32
    %c0_i32_1 = arith.constant 0 : i32
    return %c0_i32, %c0_i32_0 : i32, i32
  }
  func.func @transform_3(%arg0: i32, %arg1: i32) -> (i32, i32, i32) {
    %c0_i32 = arith.constant 0 : i32
    %c0_i32_0 = arith.constant 0 : i32
    return %arg0, %arg1, %c0_i32 : i32, i32, i32
  }
}

</mosaic_0001>

<bundles_post_ra>
// kernel: upsampler_forward.2
= control target key start
LH: loop header
LB: loop body
LE: loop exit
PB: predicated region body
PF: predicated region fallthrough
CT: control target
= control target key end

     0   :  { %s1095_s12 = smov 0   ;;  %s1097_s13 = smov 0   ;;  %s1294_s0 = inlined_call_operand.vmem [shape: bf16[4,512,16], index: 0, kind: input, shape index: {}]   ;;  %s1295_s1 = inlined_call_operand.vmem [shape: bf16[4,16,128], index: 1, kind: input, shape index: {}]   ;;  %s1296_s2 = inlined_call_operand.vmem [shape: f32[4,512,128], index: 2, kind: output, shape index: {0}]   ;;  %s1297_s3 = inlined_call_operand.vmem [shape: f32[4,2,8,128], index: 3, kind: output, shape index: {1}]  }
   0x1   :  { %s1099_s14 = smov 0   ;;  %s1101_s15 = smov 0  }
   0x2   :  { %s1103_s16 = smov 0  }
   0x3 LB: > { %s23_s17 = sadd.s32 1, %s1065_s14  ;;  %s26_s18 = sadd.s32 1, %s1069_s15  ;;  %s1073_s16 = sphi %s1103_s16, %s14_s16   ;;  %s1069_s15 = sphi %s1101_s15, %s1301_s15   ;;  %s1065_s14 = sphi %s1099_s14, %s1300_s14   ;;  %s1061_s13 = sphi %s1097_s13, %s1299_s13   ;;  %s1057_s12 = sphi %s1095_s12, %s1298_s12  }
   0x4   : > { %p24_p0 = scmp.ge.s32.totalorder %s23_s17, 2  ;;  %p878_p1 = scmp.ge.s32.totalorder %s1073_s16, 1 }
   0x5   : > { %p173_p2 = scmp.lt.s32.totalorder %s1073_s16, 9 }
   0x6   : > { %s1303_s17 = smov (%p24_p0, %s23_s17), 0  ;;  %s1305_s18 = smov (!%p24_p0, %s26_s18), %s1069_s15 }
   0x7   : > { %p174_p3 = pnand %p878_p1, %p173_p2  ;;  %p28_p4 = scmp.ge.s32.totalorder %s1305_s18, 4 }
   0x8   : > { %s879_s19 = sshll.u32 (!%p174_p3), %s1057_s12, 5  ;;  %p219_p5 = scmp.lt.s32.totalorder (!%p174_p3), %s1061_s13, 3  ;;  %vm372_vm0 = vcmask (!%p174_p3), 130048   ;;  %vm720_vm1 = vcmask (!%p174_p3), 1040384   ;;  %vm722_vm2 = vcmask (!%p174_p3), 1041408  }
   0x9   : > { %s1307_s18 = smov (%p28_p4, %s1305_s18), 0  ;;  %177 = sbr.rel (%p174_p3) target bundleno = 318 (0x13e), region = 28 }
   0xa   : > { %p221_p6 = scmp.lt.s32.totalorder (!%p174_p3), %s879_s19, 63  ;;  %p245_p7 = scmp.lt.s32.totalorder (!%p174_p3), %s1057_s12, 1 }
  0x10   : > { %s1309_s13 = smov (!%p219_p5, %s1061_s13), 3  ;;  %s1311_s19 = smov (!%p221_p6, %s879_s19), 63 }
  0x11   : > { %s880_s20 = sshll.u32 %s1309_s13, 6  ;;  %s924_s21 = sshll.u32 %s1309_s13, 3 }
  0x12   : > { %s1132_s22 = sadd.s32 %s880_s20, %s1311_s19  ;;  %s232_s25 = scalar_lea.vmem %s1295_s1, %s924_s21 }
  0x13   : > { %s881_s26 = sshll.u32 %s1132_s22, 2  ;;  %v1018_v0 = vld [vmem:[%s232_s25] sm:$0xff]   ;;  %s886_s30 = sshll.u32 %s1132_s22, 3 }
  0x14   : > { %s1141_s29 = scalar_lea.vmem %s1294_s0, %s881_s26  ;;  %942 = vmatprep.subr.bf16.mxu0 %v1018_v0  ;;  %976 = vmatprep.subr.bf16.mxu1 %v1018_v0  ;;  %s1179_s6 = scalar_lea.vmem %s1296_s2, %s886_s30 }
  0x15   : > { %v1019_v1 = vld [vmem:[%s1141_s29] sm:$0xff]   ;;  %v1020_v2 = vld [vmem:[%s1141_s29 + $0x8] sm:$0xff]   ;;  %943 = vmatpush3.bf16.msra.mxu0 %v1018_v0  ;;  %v1021_v3 = vld [vmem:[%s1141_s29 + $0x10] sm:$0xff]   ;;  %977 = vmatpush3.bf16.msra.mxu1 %v1018_v0  ;;  %s1313_s12 = smov (!%p245_p7, %s1057_s12), 1  ;;  %s887_s7 = sshll.u32 %s1309_s13, 1 }
  0x16   : > { %944 = vmatprep.mubr.msk.bf16.mxu0 %vm372_vm0, %v1019_v1  ;;  %v1022_v4 = vld [vmem:[%s1141_s29 + $0x18] sm:$0xff]   ;;  %v1023_v5 = vld [vmem:[%s1141_s29 + $0x20] sm:$0xff]   ;;  %v1028_v7 = vld [vmem:[%s1141_s29 + $0x48] sm:$0xff]   ;;  %s248_s8 = sadd.s32 %s887_s7, %s1313_s12 }
  0x17   : > { %v1027_v6 = vld [vmem:[%s1141_s29 + $0x40] sm:$0xff]   ;;  %v1029_v8 = vld [vmem:[%s1141_s29 + $0x50] sm:$0xff]   ;;  %v1030_v9 = vld [vmem:[%s1141_s29 + $0x58] sm:$0xff]   ;;  %s888_s9 = sshll.u32 %s248_s8, 3 }
  0x18   : > { %945 = vmatmul.mubr.msk.bf16.vlgmr.msra.gmra.mrb[0].mxu0 %vm372_vm0, %v1020_v2  ;;  %960 = vmatprep.mubr.msk.bf16.mxu1 %vm372_vm0, %v1027_v6  ;;  %v1031_v10 = vld [vmem:[%s1141_s29 + $0x60] sm:$0xff]   ;;  %v1024_v11 = vld [vmem:[%s1141_s29 + $0x28] sm:$0xff]   ;;  %v1025_v12 = vld [vmem:[%s1141_s29 + $0x30] sm:$0xff]   ;;  %s250_s19 = scalar_lea.vmem %s1297_s3, %s888_s9 }
  0x19   : > { %948 = vmatprep.mubr.msk.bf16.mxu0 %vm372_vm0, %v1021_v3  ;;  %961 = vmatmul.mubr.msk.bf16.vlgmr.msra.gmra.mrb[0].mxu1 %vm372_vm0, %v1028_v7  ;;  %v1032_v13 = vld [vmem:[%s1141_s29 + $0x68] sm:$0xff]   ;;  %v1033_v14 = vld [vmem:[%s1141_s29 + $0x70] sm:$0xff]   ;;  %v1026_v15 = vld [vmem:[%s1141_s29 + $0x38] sm:$0xff]  }
  0x1a   : > { %964 = vmatprep.mubr.msk.bf16.mxu1 %vm372_vm0, %v1029_v8  ;;  %v1034_v16 = vld [vmem:[%s1141_s29 + $0x78] sm:$0xff]  }
  0x20   : > { %949 = vmatmul.mubr.msk.bf16.gmra.mrb[4].mxu0 %vm372_vm0, %v1022_v4 }
  0x21   : > { %952 = vmatprep.mubr.msk.bf16.mxu0 %vm372_vm0, %v1023_v5  ;;  %965 = vmatmul.mubr.msk.bf16.gmra.mrb[4].mxu1 %vm372_vm0, %v1030_v9 }
  0x22   : > { %968 = vmatprep.mubr.msk.bf16.mxu1 %vm372_vm0, %v1031_v10 }
  0x28   : > { %953 = vmatmul.mubr.msk.bf16.gmra.mrb[8].mxu0 %vm372_vm0, %v1024_v11 }
  0x29   : > { %956 = vmatprep.mubr.msk.bf16.mxu0 %vm372_vm0, %v1025_v12  ;;  %969 = vmatmul.mubr.msk.bf16.gmra.mrb[8].mxu1 %vm372_vm0, %v1032_v13 }
  0x2a   : > { %972 = vmatprep.mubr.msk.bf16.mxu1 %vm372_vm0, %v1033_v14 }
  0x30   : > { %957 = vmatmul.mubr.msk.bf16.gmra.mrb[12].mxu0 %vm372_vm0, %v1026_v15 }
  0x31   : > { %973 = vmatmul.mubr.msk.bf16.gmra.mrb[12].mxu1 %vm372_vm0, %v1034_v16 }
  0xeb   : > { %v946_v17 = vpop.f32.mrb[0].mxu0 }
  0xec   : > { %584 = vst [vmem:[%s1179_s6 + $0x10] sm:$0xff] %v946_v17  ;;  %v455_v18 = vpop.f32.mrb[1].mxu0  ;;  %v653_v24 = vmul.f32 %v946_v17, %v946_v17  ;;  %v1185_v27 = vpop.f32.mrb[0].mxu1 }
  0xed   : > { %582 = vst [vmem:[%s1179_s6] sm:$0xff] %v455_v18  ;;  %v947_v19 = vpop.f32.mrb[2].mxu0  ;;  %v651_v21 = vmul.f32 %v455_v18, %v455_v18  ;;  %600 = vst [vmem:[%s1179_s6 + $0x90] sm:$0xff] %v1185_v27  ;;  %v1189_v28 = vpop.f32.mrb[1].mxu1 }
  0xee   : > { %585 = vst [vmem:[%s1179_s6 + $0x18] sm:$0xff] %v947_v19  ;;  %v458_v20 = vpop.f32.mrb[3].mxu0  ;;  %v654_v29 = vmul.f32 %v947_v19, %v947_v19  ;;  %598 = vst [vmem:[%s1179_s6 + $0x80] sm:$0xff] %v1189_v28  ;;  %v1193_v33 = vpop.f32.mrb[2].mxu1 }
  0xef   : > { %583 = vst [vmem:[%s1179_s6 + $0x8] sm:$0xff] %v458_v20  ;;  %v614_v22 = vadd.f32 %v458_v20, %v455_v18  ;;  %v652_v23 = vmul.f32 %v458_v20, %v458_v20  ;;  %601 = vst [vmem:[%s1179_s6 + $0x98] sm:$0xff] %v1193_v33  ;;  %v1198_v35 = vpop.f32.mrb[3].mxu1 }
  0xf0   : > { %599 = vst [vmem:[%s1179_s6 + $0x88] sm:$0xff] %v1198_v35 }
  0xf1   : > { %v615_v25 = vadd.f32 %v946_v17, %v614_v22  ;;  %v683_v26 = vadd.f32 %v652_v23, %v651_v21 }
  0xf3   : > { %v684_v30 = vadd.f32 %v683_v26, %v653_v24  ;;  %v950_v31 = vpop.f32.mrb[4].mxu0  ;;  %v616_v32 = vadd.f32 %v947_v19, %v615_v25 }
  0xf4   : > { %588 = vst [vmem:[%s1179_s6 + $0x30] sm:$0xff] %v950_v31  ;;  %v471_v34 = vpop.f32.mrb[5].mxu0  ;;  %v657_v44 = vmul.f32 %v950_v31, %v950_v31  ;;  %v1205_v47 = vpop.f32.mrb[4].mxu1 }
  0xf5   : > { %586 = vst [vmem:[%s1179_s6 + $0x20] sm:$0xff] %v471_v34  ;;  %v617_v36 = vadd.f32 %v616_v32, %v471_v34  ;;  %v655_v37 = vmul.f32 %v471_v34, %v471_v34  ;;  %v685_v38 = vadd.f32 %v684_v30, %v654_v29  ;;  %v951_v39 = vpop.f32.mrb[6].mxu0  ;;  %604 = vst [vmem:[%s1179_s6 + $0xb0] sm:$0xff] %v1205_v47  ;;  %v1209_v48 = vpop.f32.mrb[5].mxu1 }
  0xf6   : > { %589 = vst [vmem:[%s1179_s6 + $0x38] sm:$0xff] %v951_v39  ;;  %v474_v40 = vpop.f32.mrb[7].mxu0  ;;  %v658_v49 = vmul.f32 %v951_v39, %v951_v39  ;;  %602 = vst [vmem:[%s1179_s6 + $0xa0] sm:$0xff] %v1209_v48  ;;  %v1213_v53 = vpop.f32.mrb[6].mxu1  ;;  %v667_v30 = vmul.f32 %v1189_v28, %v1189_v28 }
  0xf7   : > { %v686_v41 = vadd.f32 %v685_v38, %v655_v37  ;;  %587 = vst [vmem:[%s1179_s6 + $0x28] sm:$0xff] %v474_v40  ;;  %v618_v42 = vadd.f32 %v617_v36, %v474_v40  ;;  %v656_v43 = vmul.f32 %v474_v40, %v474_v40  ;;  %605 = vst [vmem:[%s1179_s6 + $0xb8] sm:$0xff] %v1213_v53  ;;  %v1218_v55 = vpop.f32.mrb[7].mxu1 }
  0xf8   : > { %603 = vst [vmem:[%s1179_s6 + $0xa8] sm:$0xff] %v1218_v55  ;;  %v669_v40 = vmul.f32 %v1185_v27, %v1185_v27 }
  0xf9   : > { %v619_v45 = vadd.f32 %v950_v31, %v618_v42  ;;  %v687_v46 = vadd.f32 %v686_v41, %v656_v43  ;;  %v670_v43 = vmul.f32 %v1193_v33, %v1193_v33 }
  0xfb   : > { %v688_v50 = vadd.f32 %v687_v46, %v657_v44  ;;  %v954_v51 = vpop.f32.mrb[8].mxu0  ;;  %v620_v52 = vadd.f32 %v951_v39, %v619_v45  ;;  %v668_v39 = vmul.f32 %v1198_v35, %v1198_v35  ;;  %v671_v45 = vmul.f32 %v1209_v48, %v1209_v48 }
  0xfc   : > { %592 = vst [vmem:[%s1179_s6 + $0x50] sm:$0xff] %v954_v51  ;;  %v487_v54 = vpop.f32.mrb[9].mxu0  ;;  %v661_v0 = vmul.f32 %v954_v51, %v954_v51  ;;  %v1225_v3 = vpop.f32.mrb[8].mxu1 }
  0xfd   : > { %590 = vst [vmem:[%s1179_s6 + $0x40] sm:$0xff] %v487_v54  ;;  %v621_v56 = vadd.f32 %v620_v52, %v487_v54  ;;  %v659_v57 = vmul.f32 %v487_v54, %v487_v54  ;;  %v689_v58 = vadd.f32 %v688_v50, %v658_v49  ;;  %v955_v59 = vpop.f32.mrb[10].mxu0  ;;  %608 = vst [vmem:[%s1179_s6 + $0xd0] sm:$0xff] %v1225_v3  ;;  %v551_v4 = vpop.f32.mrb[9].mxu1 }
  0xfe   : > { %593 = vst [vmem:[%s1179_s6 + $0x58] sm:$0xff] %v955_v59  ;;  %v490_v60 = vpop.f32.mrb[11].mxu0  ;;  %v662_v5 = vmul.f32 %v955_v59, %v955_v59  ;;  %606 = vst [vmem:[%s1179_s6 + $0xc0] sm:$0xff] %v551_v4  ;;  %v1230_v9 = vpop.f32.mrb[10].mxu1 }
  0xff   : > { %v690_v61 = vadd.f32 %v689_v58, %v659_v57  ;;  %591 = vst [vmem:[%s1179_s6 + $0x48] sm:$0xff] %v490_v60  ;;  %v622_v62 = vadd.f32 %v621_v56, %v490_v60  ;;  %v660_v63 = vmul.f32 %v490_v60, %v490_v60  ;;  %609 = vst [vmem:[%s1179_s6 + $0xd8] sm:$0xff] %v1230_v9  ;;  %v554_v11 = vpop.f32.mrb[11].mxu1 }
 0x100   : > { %607 = vst [vmem:[%s1179_s6 + $0xc8] sm:$0xff] %v554_v11 }
 0x101   : > { %v623_v1 = vadd.f32 %v954_v51, %v622_v62  ;;  %v691_v2 = vadd.f32 %v690_v61, %v660_v63  ;;  %v672_v51 = vmul.f32 %v1218_v55, %v1218_v55  ;;  %v676_v62 = vmul.f32 %v554_v11, %v554_v11 }
 0x103   : > { %v692_v6 = vadd.f32 %v691_v2, %v661_v0  ;;  %v958_v7 = vpop.f32.mrb[12].mxu0  ;;  %v624_v8 = vadd.f32 %v955_v59, %v623_v1 }
 0x104   : > { %596 = vst [vmem:[%s1179_s6 + $0x70] sm:$0xff] %v958_v7  ;;  %v503_v10 = vpop.f32.mrb[13].mxu0  ;;  %v665_v20 = vmul.f32 %v958_v7, %v958_v7  ;;  %v974_v23 = vpop.f32.mrb[12].mxu1 }
 0x105   : > { %594 = vst [vmem:[%s1179_s6 + $0x60] sm:$0xff] %v503_v10  ;;  %v625_v12 = vadd.f32 %v624_v8, %v503_v10  ;;  %v663_v13 = vmul.f32 %v503_v10, %v503_v10  ;;  %v693_v14 = vadd.f32 %v692_v6, %v662_v5  ;;  %v959_v15 = vpop.f32.mrb[14].mxu0  ;;  %612 = vst [vmem:[%s1179_s6 + $0xf0] sm:$0xff] %v974_v23  ;;  %v567_v24 = vpop.f32.mrb[13].mxu1 }
 0x106   : > { %597 = vst [vmem:[%s1179_s6 + $0x78] sm:$0xff] %v959_v15  ;;  %v506_v16 = vpop.f32.mrb[15].mxu0  ;;  %v666_v25 = vmul.f32 %v959_v15, %v959_v15  ;;  %610 = vst [vmem:[%s1179_s6 + $0xe0] sm:$0xff] %v567_v24  ;;  %v975_v31 = vpop.f32.mrb[14].mxu1  ;;  %v681_v10 = vmul.f32 %v974_v23, %v974_v23 }
 0x107   : > { %v694_v17 = vadd.f32 %v693_v14, %v663_v13  ;;  %595 = vst [vmem:[%s1179_s6 + $0x68] sm:$0xff] %v506_v16  ;;  %v626_v18 = vadd.f32 %v625_v12, %v506_v16  ;;  %v664_v19 = vmul.f32 %v506_v16, %v506_v16  ;;  %613 = vst [vmem:[%s1179_s6 + $0xf8] sm:$0xff] %v975_v31  ;;  %v570_v32 = vpop.f32.mrb[15].mxu1 }
 0x108   : > { %611 = vst [vmem:[%s1179_s6 + $0xe8] sm:$0xff] %v570_v32  ;;  %v680_v8 = vmul.f32 %v570_v32, %v570_v32 }
 0x109   : > { %v627_v21 = vadd.f32 %v958_v7, %v626_v18  ;;  %v695_v22 = vadd.f32 %v694_v17, %v664_v19 }
 0x10b   : > { %v696_v26 = vadd.f32 %v695_v22, %v665_v20  ;;  %v628_v29 = vadd.f32 %v959_v15, %v627_v21 }
 0x10d   : > { %v629_v34 = vadd.f32 %v628_v29, %v1189_v28  ;;  %v697_v36 = vadd.f32 %v696_v26, %v666_v25 }
 0x10f   : > { %v698_v37 = vadd.f32 %v697_v36, %v667_v30  ;;  %v630_v38 = vadd.f32 %v629_v34, %v1198_v35 }
 0x111   : > { %v631_v41 = vadd.f32 %v1185_v27, %v630_v38  ;;  %v699_v42 = vadd.f32 %v698_v37, %v668_v39  ;;  %v673_v27 = vmul.f32 %v1205_v47, %v1205_v47 }
 0x113   : > { %v700_v44 = vadd.f32 %v699_v42, %v669_v40  ;;  %v632_v28 = vadd.f32 %v1193_v33, %v631_v41  ;;  %v674_v33 = vmul.f32 %v1213_v53, %v1213_v53 }
 0x115   : > { %v633_v46 = vadd.f32 %v632_v28, %v1209_v48  ;;  %v701_v49 = vadd.f32 %v700_v44, %v670_v43  ;;  %v675_v48 = vmul.f32 %v551_v4, %v551_v4 }
 0x117   : > { %v702_v50 = vadd.f32 %v701_v49, %v671_v45  ;;  %v634_v35 = vadd.f32 %v633_v46, %v1218_v55  ;;  %v677_v55 = vmul.f32 %v1225_v3, %v1225_v3 }
 0x119   : > { %v635_v52 = vadd.f32 %v1205_v47, %v634_v35  ;;  %v703_v54 = vadd.f32 %v702_v50, %v672_v51  ;;  %v678_v47 = vmul.f32 %v1230_v9, %v1230_v9 }
 0x11b   : > { %v704_v56 = vadd.f32 %v703_v54, %v673_v27  ;;  %v636_v57 = vadd.f32 %v1213_v53, %v635_v52  ;;  %v679_v53 = vmul.f32 %v567_v24, %v567_v24 }
 0x11d   : > { %v637_v58 = vadd.f32 %v636_v57, %v551_v4  ;;  %v705_v59 = vadd.f32 %v704_v56, %v674_v33 }
 0x11f   : > { %v706_v60 = vadd.f32 %v705_v59, %v675_v48  ;;  %v638_v61 = vadd.f32 %v637_v58, %v554_v11 }
 0x121   : > { %v639_v63 = vadd.f32 %v1225_v3, %v638_v61  ;;  %v707_v0 = vadd.f32 %v706_v60, %v676_v62  ;;  %v682_v3 = vmul.f32 %v975_v31, %v975_v31 }
 0x123   : > { %v708_v1 = vadd.f32 %v707_v0, %v677_v55  ;;  %v640_v2 = vadd.f32 %v1230_v9, %v639_v63 }
 0x125   : > { %v641_v5 = vadd.f32 %v640_v2, %v567_v24  ;;  %v709_v4 = vadd.f32 %v708_v1, %v678_v47 }
 0x127   : > { %v710_v6 = vadd.f32 %v709_v4, %v679_v53  ;;  %v642_v7 = vadd.f32 %v641_v5, %v570_v32 }
 0x129   : > { %v643_v11 = vadd.f32 %v974_v23, %v642_v7  ;;  %v711_v12 = vadd.f32 %v710_v6, %v680_v8 }
 0x12b   : > { %v644_v13 = vadd.f32 %v975_v31, %v643_v11  ;;  %v712_v14 = vadd.f32 %v711_v12, %v681_v10 }
 0x12d   : > { %v645_v15 = vrot.slane %v644_v13, 4  ;;  %v713_v16 = vadd.f32 %v712_v14, %v682_v3 }
 0x12f   : > { %v646_v17 = vadd.f32 %v645_v15, %v644_v13  ;;  %v714_v18 = vrot.slane %v713_v16, 4 }
 0x131   : > { %v647_v9 = vrot.slane %v646_v17, 2  ;;  %v715_v19 = vadd.f32 %v714_v18, %v713_v16 }
 0x133   : > { %v648_v20 = vadd.f32 %v647_v9, %v646_v17  ;;  %v716_v21 = vrot.slane %v715_v19, 2 }
 0x135   : > { %v649_v22 = vrot.slane %v648_v20, 1  ;;  %v717_v24 = vadd.f32 %v716_v21, %v715_v19 }
 0x137   : > { %v718_v23 = vrot.slane %v717_v24, 1  ;;  %v650_v25 = vadd.f32 %v649_v22, %v648_v20 }
 0x139   : > { %v719_v26 = vadd.f32 %v718_v23, %v717_v24 }
 0x13b   : > { %v721_v29 = vsel %vm720_vm1, %v650_v25, %v719_v26 }
 0x13c   : > { %v723_v30 = vsel %vm722_vm2, %v721_v29, 0.0 }
 0x13d   : > { %724 = vst [vmem:[%s250_s19] sm:$0xff] %v723_v30 }
 0x13e PF: > { %s14_s16 = sadd.s32 1, %s1073_s16   ;;  %s1298_s12 = smov %s1065_s14 }
 0x13f   : > { %p11_p8 = scmp.ge.s32.totalorder %s14_s16, 10   ;;  %s1299_s13 = smov %s1069_s15 }
 0x140   : > { %s1300_s14 = smov %s1303_s17  ;;  %s1301_s15 = smov %s1307_s18 }
 0x141   :  { %13 = sbr.rel (!%p11_p8) target bundleno = 3 (0x3), region = 73 }

// kernel: upsampler_forward.3
= control target key start
LH: loop header
LB: loop body
LE: loop exit
PB: predicated region body
PF: predicated region fallthrough
CT: control target
= control target key end

     0   :  { %s589_s12 = smov 0   ;;  %s591_s13 = smov 0   ;;  %s813_s0 = inlined_call_operand.vmem [shape: f32[4,512,128], index: 0, kind: input, shape index: {}, may-alias: {0,3}]   ;;  %s814_s1 = inlined_call_operand.vmem [shape: f32[1,128], index: 1, kind: input, shape index: {}]   ;;  %s815_s2 = inlined_call_operand.vmem [shape: f32[1,128], index: 2, kind: input, shape index: {}]   ;;  %s816_s3 = inlined_call_operand.vmem [shape: f32[4,512,128], index: 3, kind: output, shape index: {}, may-alias: {0,3}]  }
   0x1   :  { %s593_s14 = smov 0   ;;  %s595_s15 = smov 0  }
   0x2   :  { %s597_s16 = smov 0  }
   0x3 LB: > { %s22_s17 = sadd.s32 1, %s559_s14  ;;  %s25_s18 = sadd.s32 1, %s563_s15  ;;  %s567_s16 = sphi %s597_s16, %s13_s16   ;;  %s563_s15 = sphi %s595_s15, %s820_s15   ;;  %s559_s14 = sphi %s593_s14, %s819_s14   ;;  %s555_s13 = sphi %s591_s13, %s818_s13   ;;  %s551_s12 = sphi %s589_s12, %s817_s12  }
   0x4   : > { %p23_p0 = scmp.ge.s32.totalorder %s22_s17, 2  ;;  %p478_p1 = scmp.ge.s32.totalorder %s567_s16, 1 }
   0x5   : > { %p158_p2 = scmp.lt.s32.totalorder %s567_s16, 9 }
   0x6   : > { %s822_s17 = smov (%p23_p0, %s22_s17), 0  ;;  %s824_s18 = smov (!%p23_p0, %s25_s18), %s563_s15 }
   0x7   : > { %p159_p3 = pnand %p478_p1, %p158_p2  ;;  %p27_p4 = scmp.ge.s32.totalorder %s824_s18, 4 }
   0x8   : > { %s479_s19 = sshll.u32 (!%p159_p3), %s551_s12, 5  ;;  %p191_p5 = scmp.lt.s32.totalorder (!%p159_p3), %s555_s13, 3  ;;  %v625_v0 = vld [vmem:[%s814_s1] ss:$0 sm:$0xff] (!%p159_p3) }
   0x9   : > { %s826_s18 = smov (%p27_p4, %s824_s18), 0  ;;  %162 = sbr.rel (%p159_p3) target bundleno = 51 (0x33), region = 32 }
   0xa   : > { %p193_p6 = scmp.lt.s32.totalorder (!%p159_p3), %s479_s19, 63  ;;  %v637_v1 = vld [vmem:[%s815_s2] ss:$0 sm:$0xff] (!%p159_p3) }
  0x10   : > { %s828_s13 = smov (!%p191_p5, %s555_s13), 3  ;;  %s830_s19 = smov (!%p193_p6, %s479_s19), 63 }
  0x11   : > { %s480_s20 = sshll.u32 %s828_s13, 6 }
  0x12   : > { %s619_s21 = sadd.s32 %s480_s20, %s830_s19 }
  0x13   : > { %s481_s22 = sshll.u32 %s619_s21, 3 }
  0x14   : > { %s632_s27 = scalar_lea.vmem %s813_s0, %s481_s22  ;;  %s679_s5 = scalar_lea.vmem %s816_s3, %s481_s22 }
  0x15   : > { %v210_v2 = vld [vmem:[%s632_s27] sm:$0xff]  ;;  %v211_v3 = vld [vmem:[%s632_s27 + $0x8] sm:$0xff]  ;;  %v212_v4 = vld [vmem:[%s632_s27 + $0x10] sm:$0xff] }
  0x16   : > { %v213_v5 = vld [vmem:[%s632_s27 + $0x18] sm:$0xff]  ;;  %v214_v6 = vld [vmem:[%s632_s27 + $0x20] sm:$0xff]  ;;  %v215_v7 = vld [vmem:[%s632_s27 + $0x28] sm:$0xff]  ;;  %v249_v8 = vmul.f32 %v625_v0, %v210_v2  ;;  %v250_v9 = vmul.f32 %v625_v0, %v211_v3  ;;  %v251_v10 = vmul.f32 %v625_v0, %v212_v4 }
  0x17   : > { %v216_v11 = vld [vmem:[%s632_s27 + $0x30] sm:$0xff]  ;;  %v217_v12 = vld [vmem:[%s632_s27 + $0x38] sm:$0xff]  ;;  %v252_v13 = vmul.f32 %v625_v0, %v213_v5  ;;  %v253_v14 = vmul.f32 %v625_v0, %v214_v6  ;;  %v254_v15 = vmul.f32 %v625_v0, %v215_v7  ;;  %v218_v20 = vld [vmem:[%s632_s27 + $0x40] sm:$0xff] }
  0x18   : > { %v288_v16 = vadd.f32 %v637_v1, %v249_v8  ;;  %v289_v17 = vadd.f32 %v637_v1, %v250_v9  ;;  %v290_v18 = vadd.f32 %v637_v1, %v251_v10  ;;  %v255_v19 = vmul.f32 %v625_v0, %v216_v11  ;;  %v219_v21 = vld [vmem:[%s632_s27 + $0x48] sm:$0xff]  ;;  %v220_v22 = vld [vmem:[%s632_s27 + $0x50] sm:$0xff]  ;;  %v221_v27 = vld [vmem:[%s632_s27 + $0x58] sm:$0xff] }
  0x19   : > { %v291_v23 = vadd.f32 %v637_v1, %v252_v13  ;;  %v292_v24 = vadd.f32 %v637_v1, %v253_v14  ;;  %v293_v25 = vadd.f32 %v637_v1, %v254_v15  ;;  %v256_v26 = vmul.f32 %v625_v0, %v217_v12  ;;  %v222_v28 = vld [vmem:[%s632_s27 + $0x60] sm:$0xff]  ;;  %v223_v29 = vld [vmem:[%s632_s27 + $0x68] sm:$0xff]  ;;  %v224_v34 = vld [vmem:[%s632_s27 + $0x70] sm:$0xff] }
  0x1a   : > { %v320_v30 = vmax.f32 %v288_v16, 0.0  ;;  %v321_v31 = vmax.f32 %v289_v17, 0.0  ;;  %v322_v32 = vmax.f32 %v290_v18, 0.0  ;;  %v294_v33 = vadd.f32 %v637_v1, %v255_v19  ;;  %v225_v39 = vld [vmem:[%s632_s27 + $0x78] sm:$0xff]  ;;  %v226_v44 = vld [vmem:[%s632_s27 + $0x80] sm:$0xff]  ;;  %v227_v45 = vld [vmem:[%s632_s27 + $0x88] sm:$0xff] }
  0x1b   : > { %v323_v35 = vmax.f32 %v291_v23, 0.0  ;;  %v324_v36 = vmax.f32 %v292_v24, 0.0  ;;  %v325_v37 = vmax.f32 %v293_v25, 0.0  ;;  %v295_v38 = vadd.f32 %v637_v1, %v256_v26  ;;  %v228_v46 = vld [vmem:[%s632_s27 + $0x90] sm:$0xff]  ;;  %v229_v47 = vld [vmem:[%s632_s27 + $0x98] sm:$0xff]  ;;  %v230_v48 = vld [vmem:[%s632_s27 + $0xa0] sm:$0xff] }
  0x1c   : > { %v326_v40 = vmax.f32 %v294_v33, 0.0  ;;  %v257_v41 = vmul.f32 %v625_v0, %v218_v20  ;;  %v258_v42 = vmul.f32 %v625_v0, %v219_v21  ;;  %v259_v43 = vmul.f32 %v625_v0, %v220_v22  ;;  %v231_v49 = vld [vmem:[%s632_s27 + $0xa8] sm:$0xff]  ;;  %v232_v50 = vld [vmem:[%s632_s27 + $0xb0] sm:$0xff]  ;;  %v233_v51 = vld [vmem:[%s632_s27 + $0xb8] sm:$0xff] }
  0x1d   : > { %v690_v52 = vld [vmem:[%s632_s27 + $0xc0] sm:$0xff]  ;;  %v693_v53 = vld [vmem:[%s632_s27 + $0xc8] sm:$0xff]  ;;  %v327_v54 = vmax.f32 %v295_v38, 0.0  ;;  %v260_v55 = vmul.f32 %v625_v0, %v221_v27  ;;  %v261_v56 = vmul.f32 %v625_v0, %v222_v28  ;;  %v262_v57 = vmul.f32 %v625_v0, %v223_v29  ;;  %v699_v58 = vld [vmem:[%s632_s27 + $0xd0] sm:$0xff] }
  0x1e   : > { %v702_v59 = vld [vmem:[%s632_s27 + $0xd8] sm:$0xff]  ;;  %v705_v60 = vld [vmem:[%s632_s27 + $0xe0] sm:$0xff]  ;;  %v296_v61 = vadd.f32 %v637_v1, %v257_v41  ;;  %v297_v62 = vadd.f32 %v637_v1, %v258_v42  ;;  %v298_v63 = vadd.f32 %v637_v1, %v259_v43  ;;  %v263_v2 = vmul.f32 %v625_v0, %v224_v34  ;;  %v712_v3 = vld [vmem:[%s632_s27 + $0xe8] sm:$0xff] }
  0x1f   : > { %v715_v4 = vld [vmem:[%s632_s27 + $0xf0] sm:$0xff]  ;;  %v718_v5 = vld [vmem:[%s632_s27 + $0xf8] sm:$0xff]  ;;  %v299_v6 = vadd.f32 %v637_v1, %v260_v55  ;;  %v300_v7 = vadd.f32 %v637_v1, %v261_v56  ;;  %v301_v8 = vadd.f32 %v637_v1, %v262_v57  ;;  %v264_v9 = vmul.f32 %v625_v0, %v225_v39 }
  0x20   : > { %352 = vst [vmem:[%s679_s5] sm:$0xff] %v320_v30  ;;  %353 = vst [vmem:[%s679_s5 + $0x8] sm:$0xff] %v321_v31  ;;  %v328_v10 = vmax.f32 %v296_v61, 0.0  ;;  %v329_v11 = vmax.f32 %v297_v62, 0.0  ;;  %v330_v12 = vmax.f32 %v298_v63, 0.0  ;;  %v302_v13 = vadd.f32 %v637_v1, %v263_v2 }
  0x21   : > { %354 = vst [vmem:[%s679_s5 + $0x10] sm:$0xff] %v322_v32  ;;  %355 = vst [vmem:[%s679_s5 + $0x18] sm:$0xff] %v323_v35  ;;  %v331_v14 = vmax.f32 %v299_v6, 0.0  ;;  %v332_v15 = vmax.f32 %v300_v7, 0.0  ;;  %v333_v16 = vmax.f32 %v301_v8, 0.0  ;;  %v303_v17 = vadd.f32 %v637_v1, %v264_v9 }
  0x22   : > { %356 = vst [vmem:[%s679_s5 + $0x20] sm:$0xff] %v324_v36  ;;  %357 = vst [vmem:[%s679_s5 + $0x28] sm:$0xff] %v325_v37  ;;  %v334_v18 = vmax.f32 %v302_v13, 0.0  ;;  %v265_v19 = vmul.f32 %v625_v0, %v226_v44  ;;  %v266_v20 = vmul.f32 %v625_v0, %v227_v45  ;;  %v267_v21 = vmul.f32 %v625_v0, %v228_v46 }
  0x23   : > { %358 = vst [vmem:[%s679_s5 + $0x30] sm:$0xff] %v326_v40  ;;  %359 = vst [vmem:[%s679_s5 + $0x38] sm:$0xff] %v327_v54  ;;  %v335_v22 = vmax.f32 %v303_v17, 0.0  ;;  %v268_v23 = vmul.f32 %v625_v0, %v229_v47  ;;  %v269_v24 = vmul.f32 %v625_v0, %v230_v48  ;;  %v270_v25 = vmul.f32 %v625_v0, %v231_v49 }
  0x24   : > { %360 = vst [vmem:[%s679_s5 + $0x40] sm:$0xff] %v328_v10  ;;  %361 = vst [vmem:[%s679_s5 + $0x48] sm:$0xff] %v329_v11  ;;  %v304_v26 = vadd.f32 %v637_v1, %v265_v19  ;;  %v305_v27 = vadd.f32 %v637_v1, %v266_v20  ;;  %v306_v28 = vadd.f32 %v637_v1, %v267_v21 }
  0x25   : > { %362 = vst [vmem:[%s679_s5 + $0x50] sm:$0xff] %v330_v12  ;;  %363 = vst [vmem:[%s679_s5 + $0x58] sm:$0xff] %v331_v14  ;;  %v271_v29 = vmul.f32 %v625_v0, %v232_v50  ;;  %v307_v30 = vadd.f32 %v637_v1, %v268_v23  ;;  %v308_v31 = vadd.f32 %v637_v1, %v269_v24 }
  0x26   : > { %364 = vst [vmem:[%s679_s5 + $0x60] sm:$0xff] %v332_v15  ;;  %365 = vst [vmem:[%s679_s5 + $0x68] sm:$0xff] %v333_v16  ;;  %v309_v32 = vadd.f32 %v637_v1, %v270_v25  ;;  %v272_v33 = vmul.f32 %v625_v0, %v233_v51  ;;  %v336_v34 = vmax.f32 %v304_v26, 0.0  ;;  %v337_v35 = vmax.f32 %v305_v27, 0.0 }
  0x27   : > { %366 = vst [vmem:[%s679_s5 + $0x70] sm:$0xff] %v334_v18  ;;  %367 = vst [vmem:[%s679_s5 + $0x78] sm:$0xff] %v335_v22  ;;  %v338_v36 = vmax.f32 %v306_v28, 0.0  ;;  %v310_v37 = vadd.f32 %v637_v1, %v271_v29  ;;  %v339_v38 = vmax.f32 %v307_v30, 0.0  ;;  %v340_v39 = vmax.f32 %v308_v31, 0.0 }
  0x28   : > { %v341_v40 = vmax.f32 %v309_v32, 0.0  ;;  %v311_v41 = vadd.f32 %v637_v1, %v272_v33  ;;  %368 = vst [vmem:[%s679_s5 + $0x80] sm:$0xff] %v336_v34  ;;  %369 = vst [vmem:[%s679_s5 + $0x88] sm:$0xff] %v337_v35  ;;  %v273_v43 = vmul.f32 %v625_v0, %v690_v52  ;;  %v274_v44 = vmul.f32 %v625_v0, %v693_v53 }
  0x29   : > { %370 = vst [vmem:[%s679_s5 + $0x90] sm:$0xff] %v338_v36  ;;  %v342_v42 = vmax.f32 %v310_v37, 0.0  ;;  %v275_v45 = vmul.f32 %v625_v0, %v699_v58  ;;  %371 = vst [vmem:[%s679_s5 + $0x98] sm:$0xff] %v339_v38  ;;  %v276_v47 = vmul.f32 %v625_v0, %v702_v59  ;;  %v277_v48 = vmul.f32 %v625_v0, %v705_v60 }
  0x2a   : > { %372 = vst [vmem:[%s679_s5 + $0xa0] sm:$0xff] %v340_v39  ;;  %373 = vst [vmem:[%s679_s5 + $0xa8] sm:$0xff] %v341_v40  ;;  %v343_v46 = vmax.f32 %v311_v41, 0.0  ;;  %v278_v49 = vmul.f32 %v625_v0, %v712_v3  ;;  %v312_v50 = vadd.f32 %v637_v1, %v273_v43  ;;  %v313_v51 = vadd.f32 %v637_v1, %v274_v44 }
  0x2b   : > { %374 = vst [vmem:[%s679_s5 + $0xb0] sm:$0xff] %v342_v42  ;;  %v314_v52 = vadd.f32 %v637_v1, %v275_v45  ;;  %v279_v53 = vmul.f32 %v625_v0, %v715_v4  ;;  %v315_v54 = vadd.f32 %v637_v1, %v276_v47  ;;  %v316_v55 = vadd.f32 %v637_v1, %v277_v48 }
  0x2c   : > { %375 = vst [vmem:[%s679_s5 + $0xb8] sm:$0xff] %v343_v46  ;;  %v317_v56 = vadd.f32 %v637_v1, %v278_v49  ;;  %v280_v57 = vmul.f32 %v625_v0, %v718_v5  ;;  %v344_v58 = vmax.f32 %v312_v50, 0.0  ;;  %v345_v59 = vmax.f32 %v313_v51, 0.0 }
  0x2d   : > { %v346_v60 = vmax.f32 %v314_v52, 0.0  ;;  %v318_v61 = vadd.f32 %v637_v1, %v279_v53  ;;  %v347_v62 = vmax.f32 %v315_v54, 0.0  ;;  %v348_v63 = vmax.f32 %v316_v55, 0.0 }
  0x2e   : > { %v349_v2 = vmax.f32 %v317_v56, 0.0  ;;  %v319_v3 = vadd.f32 %v637_v1, %v280_v57  ;;  %376 = vst [vmem:[%s679_s5 + $0xc0] sm:$0xff] %v344_v58  ;;  %377 = vst [vmem:[%s679_s5 + $0xc8] sm:$0xff] %v345_v59 }
  0x2f   : > { %378 = vst [vmem:[%s679_s5 + $0xd0] sm:$0xff] %v346_v60  ;;  %v350_v4 = vmax.f32 %v318_v61, 0.0  ;;  %379 = vst [vmem:[%s679_s5 + $0xd8] sm:$0xff] %v347_v62 }
  0x30   : > { %380 = vst [vmem:[%s679_s5 + $0xe0] sm:$0xff] %v348_v63  ;;  %381 = vst [vmem:[%s679_s5 + $0xe8] sm:$0xff] %v349_v2  ;;  %v351_v0 = vmax.f32 %v319_v3, 0.0 }
  0x31   : > { %382 = vst [vmem:[%s679_s5 + $0xf0] sm:$0xff] %v350_v4 }
  0x32   : > { %383 = vst [vmem:[%s679_s5 + $0xf8] sm:$0xff] %v351_v0 }
  0x33 PF: > { %s13_s16 = sadd.s32 1, %s567_s16   ;;  %s817_s12 = smov %s559_s14 }
  0x34   : > { %p10_p7 = scmp.ge.s32.totalorder %s13_s16, 10   ;;  %s818_s13 = smov %s563_s15 }
  0x35   : > { %s819_s14 = smov %s822_s17  ;;  %s820_s15 = smov %s826_s18 }
  0x36   :  { %12 = sbr.rel (!%p10_p7) target bundleno = 3 (0x3), region = 62 }

</bundles_post_ra>
